<compile_context>
chip_gen: v7x
topology: tpu7x:2x2x1
jax: 0.10.0
libtpu: 0.0.40
codegen_flags: <defaults>
</compile_context>

<pallas_src>
import functools

import jax
import jax.numpy as jnp
from jax import lax
from jax.experimental import pallas as pl
from jax.experimental.pallas import tpu as pltpu

LANES = 128
SUBLANES = 8
CHUNK_ROWS = 128   # per-iteration sub-chunk: 16 f32 vregs per loaded array, peak live set
                   # ~48 of 64 vregs, so the elementwise chain never round-trips VMEM.


def _tpu_config():
    """Return (num_parallel, max_rows_per_tile) for the local TPU generation.

    num_parallel = how many TensorCores to shard the tile loop across (grid axis 0,
    "parallel").  max_rows_per_tile is chosen so 2 inputs x 2 pipeline buffers x
    rows*128*4B fits the generation's scoped-VMEM default without an override.
    """
    try:
        kind = jax.devices()[0].device_kind.lower()
    except Exception:
        kind = ""
    if "v7" in kind or "7x" in kind:
        return 2, 8192       # 2 TCs/chip; 4 MiB/input/buffer -> 16 MiB vs 32 MiB scoped
    if "v6" in kind:
        return 1, 8192       # 1 TC; 16 MiB vs 32 MiB scoped default
    if "v5e" in kind or ("v5" in kind and "lite" in kind):
        return 1, 4096       # v5e: 1 TC, 16 MiB scoped default -> keep total at 8 MiB
    if "v5" in kind or "v4" in kind:
        return 2, 4096       # v5p / v4 megacore (2 TCs behind one device)
    return 1, 4096           # unknown: conservative


def _tile_loss_sum(pred_ref, true_ref, valid_rows, *, delta, factor):
    """Sum of the weighted-Huber loss over rows [0, valid_rows) of the current tile,
    folded to a single (8, 128) f32 partial.

    Pure VPU work: no cross-lane reductions, no iota/masking.  `valid_rows` is a static
    Python int, so the ragged boundary tile simply reads fewer rows instead of masking
    undefined data in the partial block.
    """

    def chunk_partial(r0, nrows):
        pred = pred_ref[pl.ds(r0, nrows), :].astype(jnp.float32)
        true = true_ref[pl.ds(r0, nrows), :].astype(jnp.float32)
        error = true - pred
        abs_error = jnp.abs(error)
        quadratic = jnp.minimum(abs_error, jnp.float32(delta))
        linear = abs_error - quadratic
        loss = 0.5 * quadratic * quadratic + jnp.float32(delta) * linear
        weighted = loss * (1.0 + jnp.float32(factor) * abs_error)
        # Fold (nrows, 128) -> (8, 128): vreg-aligned adds only (no XLU work).
        return weighted.reshape(-1, SUBLANES, LANES).sum(axis=0)

    acc = jnp.zeros((SUBLANES, LANES), jnp.float32)
    n_full = valid_rows // CHUNK_ROWS
    rem = valid_rows % CHUNK_ROWS

    if n_full > 0:
        def body(c, a):
            r0 = pl.multiple_of(c * CHUNK_ROWS, CHUNK_ROWS)
            return a + chunk_partial(r0, CHUNK_ROWS)
        acc = lax.fori_loop(0, n_full, body, acc)
    if rem > 0:
        acc = acc + chunk_partial(n_full * CHUNK_ROWS, rem)
    return acc


def _huber_kernel(pred_ref, true_ref, out_ref, *, delta, factor,
                  tiles_per_core, n_tiles, rows_per_tile, valid_rows_last):
    p = pl.program_id(0)            # TensorCore (parallel) axis
    i = pl.program_id(1)            # sequential tile (reduction) axis
    tile_idx = p * tiles_per_core + i
    last = n_tiles - 1

    # Fresh (8,128) partial at the start of each core's sweep.
    @pl.when(i == 0)
    def _():
        out_ref[...] = jnp.zeros_like(out_ref)

    if valid_rows_last == rows_per_tile:
        # All real tiles are full; only skip the clamped duplicate tiles that appear when
        # n_tiles does not split evenly across cores.
        @pl.when(tile_idx <= last)
        def _():
            out_ref[...] += _tile_loss_sum(pred_ref, true_ref, rows_per_tile,
                                           delta=delta, factor=factor)
    else:
        @pl.when(tile_idx < last)
        def _():
            out_ref[...] += _tile_loss_sum(pred_ref, true_ref, rows_per_tile,
                                           delta=delta, factor=factor)

        # Ragged boundary tile: statically read only the valid rows; the rest of the
        # partial block is undefined and is never touched.
        @pl.when(tile_idx == last)
        def _():
            out_ref[...] += _tile_loss_sum(pred_ref, true_ref, valid_rows_last,
                                           delta=delta, factor=factor)


def modified_huber_loss(y_pred, y_true, delta=1.0, factor=1.5, max_rows_per_tile=None):
    assert y_pred.shape == y_true.shape, "y_pred / y_true must have the same shape"
    n_elems = y_pred.size
    assert n_elems > 0, "mean of an empty tensor is undefined"

    num_parallel, default_rows = _tpu_config()
    if max_rows_per_tile is None:
        max_rows_per_tile = default_rows
    assert max_rows_per_tile % SUBLANES == 0

    flat_pred = y_pred.reshape(-1)
    flat_true = y_true.reshape(-1)

    # 1024-aligned prefix goes through the kernel (free reshape, no pad copy); the
    # <1024-element ragged tail (if any) is summed in plain JAX in the wrapper.
    tile_elems = SUBLANES * LANES
    n_main = (n_elems // tile_elems) * tile_elems
    n_tail = n_elems - n_main

    total = jnp.zeros((), jnp.float32)

    if n_main:
        rows = n_main // LANES                       # multiple of 8
        pred2d = lax.slice(flat_pred, (0,), (n_main,)).reshape(rows, LANES)
        true2d = lax.slice(flat_true, (0,), (n_main,)).reshape(rows, LANES)

        rows_per_tile = min(max_rows_per_tile, rows)  # multiple of 8, never over the array
        n_tiles = pl.cdiv(rows, rows_per_tile)
        num_parallel = min(num_parallel, n_tiles)
        tiles_per_core = pl.cdiv(n_tiles, num_parallel)
        valid_rows_last = rows - (n_tiles - 1) * rows_per_tile
        last = n_tiles - 1

        def in_map(p, i):
            # Clamp so the automatic DMA never targets a block starting past the array;
            # clamped duplicate tiles are skipped (no compute) inside the kernel.
            return (jnp.minimum(p * tiles_per_core + i, last), 0)

        kernel = functools.partial(
            _huber_kernel,
            delta=float(delta), factor=float(factor),
            tiles_per_core=tiles_per_core, n_tiles=n_tiles,
            rows_per_tile=rows_per_tile, valid_rows_last=valid_rows_last)

        partials = pl.pallas_call(
            kernel,
            out_shape=jax.ShapeDtypeStruct((num_parallel * SUBLANES, LANES), jnp.float32),
            grid=(num_parallel, tiles_per_core),
            in_specs=[pl.BlockSpec((rows_per_tile, LANES), in_map),
                      pl.BlockSpec((rows_per_tile, LANES), in_map)],
            out_specs=pl.BlockSpec((SUBLANES, LANES), lambda p, i: (p, 0)),
            compiler_params=pltpu.CompilerParams(
                dimension_semantics=("parallel", "arbitrary")),
        )(pred2d, true2d)

        total = total + jnp.sum(partials)

    if n_tail:
        # TODO(synk): tail (<1024 elems) handled in plain JAX; negligible work.
        tail_pred = lax.slice(flat_pred, (n_main,), (n_elems,)).astype(jnp.float32)
        tail_true = lax.slice(flat_true, (n_main,), (n_elems,)).astype(jnp.float32)
        error = tail_true - tail_pred
        abs_error = jnp.abs(error)
        quadratic = jnp.minimum(abs_error, jnp.float32(delta))
        linear = abs_error - quadratic
        loss = 0.5 * quadratic * quadratic + jnp.float32(delta) * linear
        total = total + jnp.sum(loss * (1.0 + jnp.float32(factor) * abs_error))

    return total / jnp.float32(n_elems)


def _reference(y_pred, y_true, delta=1.0, factor=1.5):
    error = y_true - y_pred
    abs_error = jnp.abs(error)
    quadratic = jnp.minimum(abs_error, delta)
    linear = abs_error - quadratic
    loss = 0.5 * quadratic ** 2 + delta * linear
    return jnp.mean(loss * (1.0 + factor * abs_error))


if __name__ == "__main__":
    key = jax.random.PRNGKey(0)
    k1, k2, k3, k4, k5, k6 = jax.random.split(key, 6)

    # 1) Lane-aligned fast path (no copies, single tile).
    shape = (2, 4, 16, 16)
    y_pred = jax.random.normal(k1, shape, dtype=jnp.float32)
    y_true = jax.random.normal(k2, shape, dtype=jnp.float32)
    out = modified_huber_loss(y_pred, y_true, delta=1.0, factor=1.5)
    jax.block_until_ready(out)
    ref = _reference(y_pred, y_true, delta=1.0, factor=1.5)
    assert jnp.allclose(out, ref, rtol=1e-5, atol=1e-5), (out, ref)

    # 2) Tiny ragged input: handled entirely by the plain-JAX tail path.
    shape2 = (3, 7, 11)
    y_pred2 = jax.random.normal(k3, shape2, dtype=jnp.float32)
    y_true2 = jax.random.normal(k4, shape2, dtype=jnp.float32)
    out2 = modified_huber_loss(y_pred2, y_true2, delta=0.5, factor=2.0)
    jax.block_until_ready(out2)
    ref2 = _reference(y_pred2, y_true2, delta=0.5, factor=2.0)
    assert jnp.allclose(out2, ref2, rtol=1e-5, atol=1e-5), (out2, ref2)

    # 3) Multi-tile path with a ragged boundary tile (and duplicate-tile skip on 2-TC
    #    chips) plus a ragged tail, using a small tile override to keep the test tiny.
    shape3 = (41, 128)
    y_pred3 = jax.random.normal(k5, shape3, dtype=jnp.float32)
    y_true3 = jax.random.normal(k6, shape3, dtype=jnp.float32)
    out3 = modified_huber_loss(y_pred3, y_true3, delta=1.0, factor=1.5,
                               max_rows_per_tile=16)
    jax.block_until_ready(out3)
    ref3 = _reference(y_pred3, y_true3, delta=1.0, factor=1.5)
    assert jnp.allclose(out3, ref3, rtol=1e-5, atol=1e-5), (out3, ref3)

    print("KERNEL_OK")
</pallas_src>

<mosaic_0001>
module attributes {stable_mosaic.version = 11 : i64} {
  func.func @_huber_kernel(%arg0: i32, %arg1: i32, %arg2: memref<16x128xf32, #tpu.memory_space<vmem>>, %arg3: memref<16x128xf32, #tpu.memory_space<vmem>>, %arg4: memref<8x128xf32, #tpu.memory_space<vmem>>) attributes {dimension_semantics = [#tpu.dimension_semantics<parallel>, #tpu.dimension_semantics<arbitrary>], iteration_bounds = array<i64: 1, 1>, scalar_prefetch = 0 : i64, scratch_operands = 0 : i64, tpu.core_type = #tpu.core_type<tc>, window_params = [{transform_indices = @transform_0, window_bounds = array<i64: 16, 128>}, {transform_indices = @transform_1, window_bounds = array<i64: 16, 128>}, {transform_indices = @transform_2, window_bounds = array<i64: 8, 128>}]} {
    %c1_i32 = arith.constant 1 : i32
    %0 = arith.muli %arg0, %c1_i32 : i32
    %1 = arith.addi %0, %arg1 : i32
    %c0_i32 = arith.constant 0 : i32
    %2 = arith.cmpi eq, %arg1, %c0_i32 : i32
    %3 = arith.extui %2 : i1 to i32
    %c0_i32_0 = arith.constant 0 : i32
    %4 = arith.cmpi ne, %3, %c0_i32_0 : i32
    scf.if %4 {
      %cst = arith.constant 0.000000e+00 : f32
      %8 = vector.broadcast %cst : f32 to vector<8x128xf32>
      %c0 = arith.constant 0 : index
      %c0_3 = arith.constant 0 : index
      %9 = vector.load %arg4[%c0, %c0_3] : memref<8x128xf32, #tpu.memory_space<vmem>>, vector<8x128xf32>
      tpu.vector_store %arg4[%c0, %c0_3], %8 {strides = array<i32>} : memref<8x128xf32, #tpu.memory_space<vmem>>, vector<8x128xf32>,
    } else {
    }
    %c0_i32_1 = arith.constant 0 : i32
    %5 = arith.cmpi sle, %1, %c0_i32_1 : i32
    %6 = arith.extui %5 : i1 to i32
    %c0_i32_2 = arith.constant 0 : i32
    %7 = arith.cmpi ne, %6, %c0_i32_2 : i32
    scf.if %7 {
      %c0 = arith.constant 0 : index
      %c0_3 = arith.constant 0 : index
      %8 = vector.load %arg4[%c0, %c0_3] : memref<8x128xf32, #tpu.memory_space<vmem>>, vector<8x128xf32>
      %cst = arith.constant 0.000000e+00 : f32
      %9 = vector.broadcast %cst : f32 to vector<8x128xf32>
      %c0_4 = arith.constant 0 : index
      %c0_5 = arith.constant 0 : index
      %10 = vector.load %arg2[%c0_4, %c0_5] : memref<16x128xf32, #tpu.memory_space<vmem>>, vector<16x128xf32>
      %c0_6 = arith.constant 0 : index
      %c0_7 = arith.constant 0 : index
      %11 = vector.load %arg3[%c0_6, %c0_7] : memref<16x128xf32, #tpu.memory_space<vmem>>, vector<16x128xf32>
      %12 = arith.subf %11, %10 : vector<16x128xf32>
      %13 = math.absf %12 : vector<16x128xf32>
      %cst_8 = arith.constant 1.000000e+00 : f32
      %14 = vector.broadcast %cst_8 : f32 to vector<16x128xf32>
      %15 = arith.minimumf %13, %14 : vector<16x128xf32>
      %16 = arith.subf %13, %15 : vector<16x128xf32>
      %cst_9 = arith.constant 5.000000e-01 : f32
      %17 = vector.broadcast %cst_9 : f32 to vector<16x128xf32>
      %18 = arith.mulf %17, %15 : vector<16x128xf32>
      %19 = arith.mulf %18, %15 : vector<16x128xf32>
      %cst_10 = arith.constant 1.000000e+00 : f32
      %20 = vector.broadcast %cst_10 : f32 to vector<16x128xf32>
      %21 = arith.mulf %20, %16 : vector<16x128xf32>
      %22 = arith.addf %19, %21 : vector<16x128xf32>
      %cst_11 = arith.constant 1.500000e+00 : f32
      %23 = vector.broadcast %cst_11 : f32 to vector<16x128xf32>
      %24 = arith.mulf %23, %13 : vector<16x128xf32>
      %cst_12 = arith.constant 1.000000e+00 : f32
      %25 = vector.broadcast %cst_12 : f32 to vector<16x128xf32>
      %26 = arith.addf %25, %24 : vector<16x128xf32>
      %27 = arith.mulf %22, %26 : vector<16x128xf32>
      %28 = vector.shape_cast %27 : vector<16x128xf32> to vector<2x8x128xf32>
      %cst_13 = arith.constant dense<0.000000e+00> : vector<8x128xf32>
      %29 = vector.multi_reduction <add>, %28, %cst_13 [0] : vector<2x8x128xf32> to vector<8x128xf32>
      %30 = arith.addf %9, %29 : vector<8x128xf32>
      %31 = arith.addf %8, %30 : vector<8x128xf32>
      %c0_14 = arith.constant 0 : index
      %c0_15 = arith.constant 0 : index
      %32 = vector.load %arg4[%c0_14, %c0_15] : memref<8x128xf32, #tpu.memory_space<vmem>>, vector<8x128xf32>
      tpu.vector_store %arg4[%c0_14, %c0_15], %31 {strides = array<i32>} : memref<8x128xf32, #tpu.memory_space<vmem>>, vector<8x128xf32>,
    } else {
    }
    return
  }
  func.func @transform_0(%arg0: i32, %arg1: i32) -> (i32, i32) {
    %c1_i32 = arith.constant 1 : i32
    %0 = arith.muli %arg0, %c1_i32 : i32
    %1 = arith.addi %0, %arg1 : i32
    %c0_i32 = arith.constant 0 : i32
    %2 = arith.minsi %1, %c0_i32 : i32
    %c0_i32_0 = arith.constant 0 : i32
    %c0_i32_1 = arith.constant 0 : i32
    return %2, %c0_i32_0 : i32, i32
  }
  func.func @transform_1(%arg0: i32, %arg1: i32) -> (i32, i32) {
    %c1_i32 = arith.constant 1 : i32
    %0 = arith.muli %arg0, %c1_i32 : i32
    %1 = arith.addi %0, %arg1 : i32
    %c0_i32 = arith.constant 0 : i32
    %2 = arith.minsi %1, %c0_i32 : i32
    %c0_i32_0 = arith.constant 0 : i32
    %c0_i32_1 = arith.constant 0 : i32
    return %2, %c0_i32_0 : i32, i32
  }
  func.func @transform_2(%arg0: i32, %arg1: i32) -> (i32, i32) {
    %c0_i32 = arith.constant 0 : i32
    %c0_i32_0 = arith.constant 0 : i32
    return %arg0, %c0_i32 : i32, i32
  }
}

</mosaic_0001>

<bundles_post_ra>
// kernel: tpu_custom_call.1
= control target key start
LH: loop header
LB: loop body
LE: loop exit
PB: predicated region body
PF: predicated region fallthrough
CT: control target
= control target key end

     0   :  { %7 = vsyncpa [#allocation3], 0  ;;  %s253_s0 = inlined_call_operand.hbm [shape: f32[16,128], index: 0, kind: input, shape index: {}]   ;;  %s254_s1 = inlined_call_operand.hbm [shape: f32[16,128], index: 1, kind: input, shape index: {}]   ;;  %s255_s2 = inlined_call_operand.hbm [shape: f32[8,128], index: 2, kind: output, shape index: {}]  }
   0x1   :  { %8 = vsyncpa [#allocation6], 0 }
   0x2   :  { %9 = vsyncpa [#allocation4], 0  ;;  %s197_s9 = smov [#allocation2]   ;;  %s125_s13 = scalar_lea.hbm %s253_s0, 256 }
   0x3   :  { %s21_s10 = sshll.u32 %s197_s9, 4  ;;  %p126_p0 = scmp.ne.s32.totalorder %s253_s0, %s125_s13  ;;  %s22_s10 = int_to_ptr.vmem [resolvable:$true] %s21_s10 }
   0x4   :  { %p129_p1 = scmp.lt.u32.totalorder %s125_s13, %s253_s0 }
   0x6   :  { %p131_p2 = pnand %p129_p1, %p126_p0 }
   0x8   :  { %134 = shalt.err (!%p131_p2)
}
   0x9   :  { %s135_s18 = scalar_lea.vmem %s22_s10, 256  ;;  %p140_p4 = scmp.lt.s32.totalorder %s22_s10, %s22_s10 }
   0xa   :  { %p136_p3 = scmp.ne.s32.totalorder %s22_s10, %s135_s18  ;;  %p141_p5 = scmp.lt.s32.totalorder %s135_s18, %s135_s18 }
   0xc   :  { %p142_p6 = por %p141_p5, %p140_p4 }
   0xe   :  { %p143_p7 = pnand %p142_p6, %p136_p3 }
  0x10   :  { %146 = shalt.err (!%p143_p7)
}
  0x11   :  { %s198_s19 = smov 128   ;;  %s199_s20 = smov 8  }
  0x12   :  { %27 = dma.hbm_to_vmem [thread:$0]  %s253_s0, 256, %s22_s10, [#allocation3], %s198_s19, %s198_s19, %s199_s20  }
  0x13   :  { %s200_s23 = smov [#allocation5]   ;;  %s147_s27 = scalar_lea.hbm %s254_s1, 256 }
  0x14   :  { %s39_s24 = sshll.u32 %s200_s23, 4  ;;  %p148_p8 = scmp.ne.s32.totalorder %s254_s1, %s147_s27  ;;  %s40_s24 = int_to_ptr.vmem [resolvable:$true] %s39_s24 }
  0x15   :  { %p151_p9 = scmp.lt.u32.totalorder %s147_s27, %s254_s1 }
  0x17   :  { %p153_p10 = pnand %p151_p9, %p148_p8 }
  0x19   :  { %156 = shalt.err (!%p153_p10)
}
  0x1a   :  { %s157_s4 = scalar_lea.vmem %s40_s24, 256  ;;  %p162_p12 = scmp.lt.s32.totalorder %s40_s24, %s40_s24 }
  0x1b   :  { %p158_p11 = scmp.ne.s32.totalorder %s40_s24, %s157_s4  ;;  %p163_p13 = scmp.lt.s32.totalorder %s157_s4, %s157_s4 }
  0x1d   :  { %p164_p0 = por %p163_p13, %p162_p12 }
  0x1f   :  { %p165_p1 = pnand %p164_p0, %p158_p11 }
  0x21   :  { %168 = shalt.err (!%p165_p1)
}
  0x22   :  { %45 = dma.hbm_to_vmem [thread:$0]  %s254_s1, 256, %s40_s24, [#allocation6], %s198_s19, %s198_s19, %s199_s20  }
  0x23   :  { %191 = dma.done.wait [#allocation3], 256  }
  0x24   :  { %192 = vsyncadd [#allocation3], 4294967040 }
  0x25   :  { %193 = dma.done.wait [#allocation6], 256  }
  0x26   :  { %194 = vsyncadd [#allocation6], 4294967040  ;;  %v71_v0 = vld [vmem:[#allocation2] sm:$0xff]  ;;  %v72_v1 = vld [vmem:[#allocation2 + $0x8] sm:$0xff]  ;;  %s201_s1 = smov [#allocation7]  }
  0x27   :  { %v73_v2 = vld [vmem:[#allocation5] sm:$0xff]  ;;  %v74_v3 = vld [vmem:[#allocation5 + $0x8] sm:$0xff]  ;;  %s105_s6 = sshll.u32 %s201_s1, 4  ;;  %s106_s6 = int_to_ptr.vmem [resolvable:$true] %s105_s6 }
  0x28   :  { %v75_v4 = vsub.f32 %v73_v2, %v71_v0  ;;  %v76_v5 = vsub.f32 %v74_v3, %v72_v1  ;;  %s169_s7 = scalar_lea.vmem %s106_s6, 128  ;;  %p174_p3 = scmp.lt.s32.totalorder %s106_s6, %s106_s6 }
  0x29   :  { %p170_p2 = scmp.ne.s32.totalorder %s106_s6, %s169_s7  ;;  %p175_p4 = scmp.lt.s32.totalorder %s169_s7, %s169_s7 }
  0x2a   :  { %v77_v6 = vand.u32 2147483647, %v75_v4  ;;  %v78_v7 = vand.u32 2147483647, %v76_v5 }
  0x2b   :  { %p176_p5 = por %p175_p4, %p174_p3 }
  0x2c   :  { %v79_v8 = vmin.f32 %v77_v6, 1.0  ;;  %v89_v9 = vmul.f32 1.5, %v77_v6  ;;  %v80_v10 = vmin.f32 %v78_v7, 1.0  ;;  %v90_v11 = vmul.f32 1.5, %v78_v7 }
  0x2d   :  { %p177_p6 = pnand %p176_p5, %p170_p2 }
  0x2e   :  { %v81_v12 = vsub.f32 %v77_v6, %v79_v8  ;;  %v83_v13 = vmul.f32 0.5, %v79_v8  ;;  %v82_v14 = vsub.f32 %v78_v7, %v80_v10  ;;  %v84_v15 = vmul.f32 0.5, %v80_v10 }
  0x2f   :  { %v91_v17 = vadd.f32 1.0, %v89_v9  ;;  %v92_v19 = vadd.f32 1.0, %v90_v11 }
  0x30   :  { %v85_v16 = vmul.f32 %v83_v13, %v79_v8  ;;  %v86_v18 = vmul.f32 %v84_v15, %v80_v10 }
  0x32   :  { %v87_v20 = vadd.f32 %v85_v16, %v81_v12  ;;  %v88_v21 = vadd.f32 %v86_v18, %v82_v14 }
  0x34   :  { %v93_v22 = vmul.f32 %v91_v17, %v87_v20  ;;  %v94_v23 = vmul.f32 %v92_v19, %v88_v21 }
  0x36   :  { %v95_v24 = vadd.f32 %v94_v23, %v93_v22 }
  0x38   :  { %98 = vst [vmem:[#allocation7] sm:$0xff] %v95_v24 }
  0x39   :  { %180 = shalt.err (!%p177_p6)
}
  0x3a   :  { %s181_s10 = scalar_lea.hbm %s255_s2, 128 }
  0x3b   :  { %p182_p7 = scmp.ne.s32.totalorder %s255_s2, %s181_s10  ;;  %p185_p8 = scmp.lt.u32.totalorder %s181_s10, %s255_s2 }
  0x3d   :  { %p187_p9 = pnand %p185_p8, %p182_p7 }
  0x3f   :  { %190 = shalt.err (!%p187_p9)
}
  0x40   :  { %108 = dma.vmem_to_hbm [thread:$0]  %s106_s6, 128, %s255_s2, [#allocation4]  }
  0x41   :  { %195 = dma.done.wait [#allocation4], 128  }
  0x42   :  { %196 = vsyncadd [#allocation4], 4294967168 }
  0x43   :  { %112 = vsyncpa [#allocation3], 1 }
  0x44   :  { %113 = vsyncpa [#allocation6], 1 }
  0x45   :  { %114 = vsyncpa [#allocation4], 1 }

</bundles_post_ra>
